<compile_context>
chip_gen: v7x
topology: tpu7x:2x2x1
jax: 0.10.0
libtpu: 0.0.40
codegen_flags: <defaults>
</compile_context>

<pallas_src>
import jax
import jax.numpy as jnp
from jax.experimental import pallas as pl
from jax.experimental.pallas import tpu as pltpu

BN_EPS = 1e-5
LANE = 128
SUBLANE = 8


def _round_up(n, m):
    return ((n + m - 1) // m) * m


def mlp_kernel(x_ref, w1_ref, b1_ref, w2_ref, b2_ref, out_ref):
    # fc1: Linear + Tanh (BN folded into fc2; Dropout is eval-mode identity).
    # Cast x to the matmul-operand dtype in-kernel (no separate wrapper cast pass over HBM).
    x = x_ref[...].astype(w1_ref.dtype)
    h = jnp.dot(x, w1_ref[...], preferred_element_type=jnp.float32)
    h = jnp.tanh(h + b1_ref[...])                       # f32 elementwise (v5e-safe: no bf16 VPU/EUP)
    # fc2: Linear (BN folded in) + ReLU; cast to the matmul dtype only for the dot.
    o = jnp.dot(h.astype(w2_ref.dtype), w2_ref[...],
                preferred_element_type=jnp.float32)
    o = o + b2_ref[...]
    out_ref[...] = jnp.maximum(o, 0.0).astype(out_ref.dtype)


def prepare_params(params, matmul_dtype=jnp.float32):
    """One-time weight transform: fold eval-mode BatchNorm1d into fc2 and lane-pad fc2's output dim."""
    w1, b1 = params["w1"], params["b1"]
    gamma, beta = params["gamma"], params["beta"]
    mean, var = params["mean"], params["var"]
    w2, b2 = params["w2"], params["b2"]

    E, Dout = w2.shape
    scale = gamma.reshape(-1) * jax.lax.rsqrt(var.reshape(-1) + BN_EPS)   # (E,)
    shift = beta.reshape(-1) - mean.reshape(-1) * scale                   # (E,)
    w2_f = scale[:, None] * w2                                            # (E, Dout)
    b2_f = b2.reshape(-1) + shift @ w2                                    # (Dout,)

    # Zero-pad output features to a multiple of 128 (ReLU(0+0)=0 -> padded cols are exactly 0).
    Dout_p = _round_up(Dout, LANE)
    pad = Dout_p - Dout
    w2_f = jnp.pad(w2_f, ((0, 0), (0, pad)))
    b2_f = jnp.pad(b2_f, ((0, pad),))

    return dict(
        w1=w1.astype(matmul_dtype),
        b1=b1.reshape(1, -1).astype(jnp.float32),
        w2=w2_f.astype(matmul_dtype),
        b2=b2_f.reshape(1, -1).astype(jnp.float32),
        out_dim=Dout,
        matmul_dtype=matmul_dtype,
    )


def _vmem_capacity_bytes():
    try:
        return int(pltpu.get_tpu_info().vmem_capacity_bytes)
    except Exception:
        return 64 << 20   # conservative fallback = v7x per-TensorCore VMEM


def mlp_forward(x, prep, *, block_b=None):
    """x: (B, input_dim) float32. prep: output of prepare_params.

    Returns a (B, Dout_padded) float32 array whose columns >= prep['out_dim'] are exactly 0.
    Consumers should slice [:, :prep['out_dim']] lazily (or fuse it into the next op) rather than
    paying a separate un-pad pass here.
    """
    B, Din = x.shape
    E = prep["w1"].shape[1]
    Dout_p = prep["w2"].shape[1]
    mdt = prep["matmul_dtype"]

    if block_b is None:
        # ~10 MiB of per-row tile footprint at block_b=4096 (x 128B*2, out 512B*2, h ~2KB) ->
        # comfortably within even v7x's 64 MiB VMEM. At least 2 grid steps whenever B allows,
        # so the ("parallel",) batch axis actually shards across v7x's two TensorCores.
        cap = 4096
        min_steps = 2 if B >= 2 * SUBLANE else 1
        steps = max(min_steps, pl.cdiv(B, cap))
        block_b = pl.cdiv(B, steps)
    block_b = max(SUBLANE, _round_up(block_b, SUBLANE))
    grid = (pl.cdiv(B, block_b),)   # ragged last block: Pallas masks writes past row B

    w_isz = jnp.dtype(mdt).itemsize
    # Real per-call VMEM budget: streamed x/out double-buffered, h intermediate (+cast headroom),
    # single-buffered weights/biases.
    est = (2 * block_b * Din * 4
           + 2 * block_b * Dout_p * 4
           + 2 * block_b * E * 4
           + Din * E * w_isz + E * Dout_p * w_isz + (E + Dout_p) * 4)
    vmem_limit = int(min(max(32 << 20, int(1.3 * est)),
                         int(0.75 * _vmem_capacity_bytes())))

    full = lambda i: (0, 0)
    out = pl.pallas_call(
        mlp_kernel,
        out_shape=jax.ShapeDtypeStruct((B, Dout_p), jnp.float32),
        grid_spec=pltpu.PrefetchScalarGridSpec(
            num_scalar_prefetch=0,
            grid=grid,
            in_specs=[
                pl.BlockSpec((block_b, Din), lambda i: (i, 0)),                       # x tile (streamed, f32)
                pl.BlockSpec((Din, E), full, pipeline_mode=pl.Buffered(1)),           # W1^T (grid-invariant)
                pl.BlockSpec((1, E), full, pipeline_mode=pl.Buffered(1)),             # b1
                pl.BlockSpec((E, Dout_p), full, pipeline_mode=pl.Buffered(1)),        # folded W2^T (lane-padded)
                pl.BlockSpec((1, Dout_p), full, pipeline_mode=pl.Buffered(1)),        # folded b2
            ],
            out_specs=pl.BlockSpec((block_b, Dout_p), lambda i: (i, 0)),
        ),
        compiler_params=pltpu.CompilerParams(
            dimension_semantics=("parallel",),
            vmem_limit_bytes=vmem_limit),
    )(x, prep["w1"], prep["b1"], prep["w2"], prep["b2"])

    return out


def init_params(key, input_dim, embedding_dim, output_dim):
    """Deterministic synthetic parameters matching PyTorch module shapes (incl. BN running stats)."""
    k1, k2, k3, k4, k5, k6, k7 = jax.random.split(key, 7)
    bound1 = 1.0 / jnp.sqrt(input_dim)
    w1 = jax.random.uniform(k1, (input_dim, embedding_dim), jnp.float32, -bound1, bound1)
    b1 = jax.random.uniform(k2, (1, embedding_dim), jnp.float32, -bound1, bound1)
    gamma = 1.0 + 0.1 * jax.random.normal(k3, (1, embedding_dim), jnp.float32)
    beta = 0.1 * jax.random.normal(k4, (1, embedding_dim), jnp.float32)
    mean = 0.05 * jax.random.normal(k5, (1, embedding_dim), jnp.float32)
    var = 1.0 + 0.1 * jax.random.uniform(k6, (1, embedding_dim), jnp.float32)
    bound2 = 1.0 / jnp.sqrt(embedding_dim)
    k7a, k7b = jax.random.split(k7)
    w2 = jax.random.uniform(k7a, (embedding_dim, output_dim), jnp.float32, -bound2, bound2)
    b2 = jax.random.uniform(k7b, (1, output_dim), jnp.float32, -bound2, bound2)
    return dict(w1=w1, b1=b1, gamma=gamma, beta=beta, mean=mean, var=var, w2=w2, b2=b2)


def mlp_reference(x, p):
    h = jnp.tanh(x @ p["w1"] + p["b1"])
    h = (h - p["mean"]) * jax.lax.rsqrt(p["var"] + BN_EPS) * p["gamma"] + p["beta"]
    return jnp.maximum(h @ p["w2"] + p["b2"], 0.0)


if __name__ == "__main__":
    INPUT_DIM, EMBEDDING_DIM, OUTPUT_DIM = 32, 256, 100

    key = jax.random.PRNGKey(0)
    kx, kp, kx2 = jax.random.split(key, 3)
    params = init_params(kp, INPUT_DIM, EMBEDDING_DIM, OUTPUT_DIM)
    prep_f32 = prepare_params(params, jnp.float32)
    Dout_p = prep_f32["w2"].shape[1]

    # --- small demo shape (single tile, f32 path) ---
    B = 8
    x = jax.random.normal(kx, (B, INPUT_DIM), jnp.float32)
    out = jax.block_until_ready(mlp_forward(x, prep_f32))
    ref = mlp_reference(x, params)
    assert out.shape == (B, Dout_p)
    assert jnp.allclose(out[:, :OUTPUT_DIM], ref, atol=2e-4, rtol=2e-4), "f32 mismatch vs JAX reference"
    assert jnp.all(out[:, OUTPUT_DIM:] == 0.0), "padded output columns must be exactly zero"

    # --- larger, non-divisible batch: 2-step parallel grid (v7x both TCs), ragged last block ---
    B2 = 1000
    x2 = jax.random.normal(kx2, (B2, INPUT_DIM), jnp.float32)
    out2 = jax.block_until_ready(mlp_forward(x2, prep_f32))
    ref2 = mlp_reference(x2, params)
    assert out2.shape == (B2, Dout_p)
    assert jnp.allclose(out2[:, :OUTPUT_DIM], ref2, atol=2e-4, rtol=2e-4), "tiled f32 mismatch vs JAX reference"

    # --- bf16 matmul-operand path (x stays f32 in HBM, cast in-kernel; f32 elementwise) ---
    prep_bf16 = prepare_params(params, jnp.bfloat16)
    out_bf = jax.block_until_ready(mlp_forward(x2, prep_bf16))
    assert out_bf.shape == (B2, Dout_p)
    assert jnp.allclose(out_bf[:, :OUTPUT_DIM], ref2, atol=5e-2, rtol=5e-2), "bf16 mismatch vs f32 reference"

    print("KERNEL_OK")
</pallas_src>

<mosaic_0001>
module attributes {stable_mosaic.version = 11 : i64} {
  func.func @mlp_kernel(%arg0: i32, %arg1: memref<8x32xf32, #tpu.memory_space<vmem>>, %arg2: memref<32x256xf32, #tpu.memory_space<vmem>>, %arg3: memref<1x256xf32, #tpu.memory_space<vmem>>, %arg4: memref<256x128xf32, #tpu.memory_space<vmem>>, %arg5: memref<1x128xf32, #tpu.memory_space<vmem>>, %arg6: memref<8x128xf32, #tpu.memory_space<vmem>>) attributes {dimension_semantics = [#tpu.dimension_semantics<parallel>], iteration_bounds = array<i64: 1>, scalar_prefetch = 0 : i64, scratch_operands = 0 : i64, tpu.core_type = #tpu.core_type<tc>, window_params = [{transform_indices = @transform_0, window_bounds = array<i64: 8, 32>}, {pipeline_mode = #tpu.pipeline_mode<synchronous>, transform_indices = @transform_1, window_bounds = array<i64: 32, 256>}, {pipeline_mode = #tpu.pipeline_mode<synchronous>, transform_indices = @transform_2, window_bounds = array<i64: 1, 256>}, {pipeline_mode = #tpu.pipeline_mode<synchronous>, transform_indices = @transform_3, window_bounds = array<i64: 256, 128>}, {pipeline_mode = #tpu.pipeline_mode<synchronous>, transform_indices = @transform_4, window_bounds = array<i64: 1, 128>}, {transform_indices = @transform_5, window_bounds = array<i64: 8, 128>}]} {
    %c0 = arith.constant 0 : index
    %c0_0 = arith.constant 0 : index
    %0 = vector.load %arg1[%c0, %c0_0] : memref<8x32xf32, #tpu.memory_space<vmem>>, vector<8x32xf32>
    %c0_1 = arith.constant 0 : index
    %c0_2 = arith.constant 0 : index
    %1 = vector.load %arg2[%c0_1, %c0_2] : memref<32x256xf32, #tpu.memory_space<vmem>>, vector<32x256xf32>
    %cst = arith.constant dense<0.000000e+00> : vector<8x256xf32>
    %2 = tpu.matmul %0, %1, %cst {dimension_numbers = #tpu.dot_dimension_numbers<[1], [0], [0], [1], [0, 0, 1, 1], [], []>} : vector<8x32xf32>, vector<32x256xf32>, vector<8x256xf32> -> vector<8x256xf32>
    %c0_3 = arith.constant 0 : index
    %c0_4 = arith.constant 0 : index
    %3 = vector.load %arg3[%c0_3, %c0_4] : memref<1x256xf32, #tpu.memory_space<vmem>>, vector<1x256xf32>
    %4 = vector.broadcast %3 : vector<1x256xf32> to vector<8x256xf32>
    %5 = arith.addf %2, %4 : vector<8x256xf32>
    %6 = math.tanh %5 : vector<8x256xf32>
    %c0_5 = arith.constant 0 : index
    %c0_6 = arith.constant 0 : index
    %7 = vector.load %arg4[%c0_5, %c0_6] : memref<256x128xf32, #tpu.memory_space<vmem>>, vector<256x128xf32>
    %cst_7 = arith.constant dense<0.000000e+00> : vector<8x128xf32>
    %8 = tpu.matmul %6, %7, %cst_7 {dimension_numbers = #tpu.dot_dimension_numbers<[1], [0], [0], [1], [0, 0, 1, 1], [], []>} : vector<8x256xf32>, vector<256x128xf32>, vector<8x128xf32> -> vector<8x128xf32>
    %c0_8 = arith.constant 0 : index
    %c0_9 = arith.constant 0 : index
    %9 = vector.load %arg5[%c0_8, %c0_9] : memref<1x128xf32, #tpu.memory_space<vmem>>, vector<1x128xf32>
    %10 = vector.broadcast %9 : vector<1x128xf32> to vector<8x128xf32>
    %11 = arith.addf %8, %10 : vector<8x128xf32>
    %cst_10 = arith.constant 0.000000e+00 : f32
    %12 = vector.broadcast %cst_10 : f32 to vector<8x128xf32>
    %13 = arith.maximumf %11, %12 : vector<8x128xf32>
    %c0_11 = arith.constant 0 : index
    %c0_12 = arith.constant 0 : index
    %14 = vector.load %arg6[%c0_11, %c0_12] : memref<8x128xf32, #tpu.memory_space<vmem>>, vector<8x128xf32>
    tpu.vector_store %arg6[%c0_11, %c0_12], %13 {strides = array<i32>} : memref<8x128xf32, #tpu.memory_space<vmem>>, vector<8x128xf32>,
    return
  }
  func.func @transform_0(%arg0: i32) -> (i32, i32) {
    %c0_i32 = arith.constant 0 : i32
    %c0_i32_0 = arith.constant 0 : i32
    return %arg0, %c0_i32 : i32, i32
  }
  func.func @transform_1(%arg0: i32) -> (i32, i32) {
    %c0_i32 = arith.constant 0 : i32
    %c0_i32_0 = arith.constant 0 : i32
    %c0_i32_1 = arith.constant 0 : i32
    return %c0_i32, %c0_i32_0 : i32, i32
  }
  func.func @transform_2(%arg0: i32) -> (i32, i32) {
    %c0_i32 = arith.constant 0 : i32
    %c0_i32_0 = arith.constant 0 : i32
    %c0_i32_1 = arith.constant 0 : i32
    return %c0_i32, %c0_i32_0 : i32, i32
  }
  func.func @transform_3(%arg0: i32) -> (i32, i32) {
    %c0_i32 = arith.constant 0 : i32
    %c0_i32_0 = arith.constant 0 : i32
    %c0_i32_1 = arith.constant 0 : i32
    return %c0_i32, %c0_i32_0 : i32, i32
  }
  func.func @transform_4(%arg0: i32) -> (i32, i32) {
    %c0_i32 = arith.constant 0 : i32
    %c0_i32_0 = arith.constant 0 : i32
    %c0_i32_1 = arith.constant 0 : i32
    return %c0_i32, %c0_i32_0 : i32, i32
  }
  func.func @transform_5(%arg0: i32) -> (i32, i32) {
    %c0_i32 = arith.constant 0 : i32
    %c0_i32_0 = arith.constant 0 : i32
    return %arg0, %c0_i32 : i32, i32
  }
}

</mosaic_0001>

<bundles_post_ra>
// kernel: tpu_custom_call.1
= control target key start
LH: loop header
LB: loop body
LE: loop exit
PB: predicated region body
PF: predicated region fallthrough
CT: control target
= control target key end

     0   :  { %10 = vsyncpa [#allocation3], 0  ;;  %s562_s0 = inlined_call_operand.hbm [shape: f32[8,32], index: 0, kind: input, shape index: {}]   ;;  %s563_s1 = inlined_call_operand.hbm [shape: f32[32,256], index: 1, kind: input, shape index: {}]   ;;  %s564_s2 = inlined_call_operand.vmem [shape: f32[1,256], index: 2, kind: input, shape index: {}]   ;;  %s565_s3 = inlined_call_operand.hbm [shape: f32[256,128], index: 3, kind: input, shape index: {}]   ;;  %s566_s4 = inlined_call_operand.vmem [shape: f32[1,128], index: 4, kind: input, shape index: {}]   ;;  %s567_s5 = inlined_call_operand.hbm [shape: f32[8,128], index: 5, kind: output, shape index: {}]  }
   0x1   :  { %11 = vsyncpa [#allocation6], 0 }
   0x2   :  { %12 = vsyncpa [#allocation4], 0  ;;  %s469_s18 = smov [#allocation5]   ;;  %s375_s22 = scalar_lea.hbm %s563_s1, 1024 }
   0x3   :  { %s28_s19 = sshll.u32 %s469_s18, 4  ;;  %p376_p0 = scmp.ne.s32.totalorder %s563_s1, %s375_s22  ;;  %s29_s19 = int_to_ptr.vmem [resolvable:$true] %s28_s19 }
   0x4   :  { %p379_p1 = scmp.lt.u32.totalorder %s375_s22, %s563_s1 }
   0x6   :  { %p381_p2 = pnand %p379_p1, %p376_p0 }
   0x8   :  { %384 = shalt.err (!%p381_p2)
}
   0x9   :  { %s385_s27 = scalar_lea.vmem %s29_s19, 1024  ;;  %p390_p4 = scmp.lt.s32.totalorder %s29_s19, %s29_s19 }
   0xa   :  { %p386_p3 = scmp.ne.s32.totalorder %s29_s19, %s385_s27  ;;  %p391_p5 = scmp.lt.s32.totalorder %s385_s27, %s385_s27 }
   0xc   :  { %p392_p6 = por %p391_p5, %p390_p4 }
   0xe   :  { %p393_p7 = pnand %p392_p6, %p386_p3 }
  0x10   :  { %396 = shalt.err (!%p393_p7)
}
  0x11   :  { %s470_s28 = smov 256   ;;  %s471_s29 = smov 16  }
  0x12   :  { %34 = dma.hbm_to_vmem [thread:$0]  %s563_s1, 1024, %s29_s19, [#allocation6], %s470_s28, %s470_s28, %s471_s29  }
  0x13   :  { %s472_s7 = smov [#allocation2]   ;;  %s473_s9 = smov [#allocation7]  }
  0x14   :  { %s19_s8 = sshll.u32 %s472_s7, 4  ;;  %s42_s10 = sshll.u32 %s473_s9, 4  ;;  %s20_s8 = int_to_ptr.vmem [resolvable:$true] %s19_s8  ;;  %s43_s10 = int_to_ptr.vmem [resolvable:$true] %s42_s10 }
  0x15   :  { %s397_s13 = scalar_lea.hbm %s562_s0, 128 }
  0x16   :  { %p398_p8 = scmp.ne.s32.totalorder %s562_s0, %s397_s13  ;;  %p401_p9 = scmp.lt.u32.totalorder %s397_s13, %s562_s0 }
  0x18   :  { %p403_p10 = pnand %p401_p9, %p398_p8 }
  0x1a   :  { %406 = shalt.err (!%p403_p10)
}
  0x1b   :  { %s407_s1 = scalar_lea.vmem %s20_s8, 128  ;;  %p412_p12 = scmp.lt.s32.totalorder %s20_s8, %s20_s8 }
  0x1c   :  { %p408_p11 = scmp.ne.s32.totalorder %s20_s8, %s407_s1  ;;  %p413_p13 = scmp.lt.s32.totalorder %s407_s1, %s407_s1 }
  0x1e   :  { %p414_p0 = por %p413_p13, %p412_p12 }
  0x20   :  { %p415_p1 = pnand %p414_p0, %p408_p11 }
  0x22   :  { %418 = shalt.err (!%p415_p1)
}
  0x23   :  { %22 = dma.hbm_to_vmem [thread:$0]  %s562_s0, 128, %s20_s8, [#allocation3]  }
  0x24   :  { %s419_s22 = scalar_lea.hbm %s565_s3, 4096 }
  0x25   :  { %p420_p2 = scmp.ne.s32.totalorder %s565_s3, %s419_s22  ;;  %p423_p3 = scmp.lt.u32.totalorder %s419_s22, %s565_s3 }
  0x27   :  { %p425_p4 = pnand %p423_p3, %p420_p2 }
  0x29   :  { %428 = shalt.err (!%p425_p4)
}
  0x2a   :  { %s429_s27 = scalar_lea.vmem %s43_s10, 4096  ;;  %p434_p6 = scmp.lt.s32.totalorder %s43_s10, %s43_s10 }
  0x2b   :  { %p430_p5 = scmp.ne.s32.totalorder %s43_s10, %s429_s27  ;;  %p435_p7 = scmp.lt.s32.totalorder %s429_s27, %s429_s27 }
  0x2d   :  { %p436_p8 = por %p435_p7, %p434_p6 }
  0x2f   :  { %p437_p9 = pnand %p436_p8, %p430_p5 }
  0x31   :  { %440 = shalt.err (!%p437_p9)
}
  0x32   :  { %s474_s0 = smov 128   ;;  %s475_s28 = smov 8  }
  0x33   :  { %48 = dma.hbm_to_vmem [thread:$0]  %s565_s3, 4096, %s43_s10, [#allocation6], %s474_s0, %s474_s0, %s475_s28  }
  0x34   :  { %463 = dma.done.wait [#allocation3], 128  }
  0x35   :  { %464 = vsyncadd [#allocation3], 4294967168 }
  0x36   :  { %465 = dma.done.wait [#allocation6], 5120  }
  0x37   :  { %466 = vsyncadd [#allocation6], 4294962176  ;;  %v476_v0 = vmov 0.0   ;;  %v62_v1 = vld [vmem:[#allocation5 + $0x8] sm:$0xff]  ;;  %v64_v2 = vld [vmem:[#allocation5 + $0x18] sm:$0xff]  ;;  %vm81_vm0 = vcmask 261120   ;;  %v71_v62 = vlaneseq }
  0x38   :  { %149 = vmatprep.mubr.f32.mxu0 %v476_v0  ;;  %v61_v3 = vld [vmem:[#allocation5] sm:$0xff]  ;;  %v322_v4 = vpack.c.bf16 %v64_v2, %v62_v1  ;;  %v63_v5 = vld [vmem:[#allocation5 + $0x10] sm:$0xff]  ;;  %v66_v6 = vld [vmem:[#allocation5 + $0x28] sm:$0xff] }
  0x39   :  { %v68_v7 = vld [vmem:[#allocation5 + $0x38] sm:$0xff]  ;;  %v324_v8 = vpack.c.bf16 %v63_v5, %v61_v3  ;;  %v65_v10 = vld [vmem:[#allocation5 + $0x20] sm:$0xff]  ;;  %v67_v11 = vld [vmem:[#allocation5 + $0x30] sm:$0xff]  ;;  %v72_v63 = vshrl.u32 %v71_v62, 7 }
  0x3a   :  { %v326_v9 = vpack.c.bf16 %v68_v7, %v66_v6  ;;  %323 = vmatprep.subr.bf16.mxu0 %v322_v4  ;;  %v174_v12 = vld [vmem:[#allocation7 + $0x80] sm:$0xff]  ;;  %v175_v13 = vld [vmem:[#allocation7 + $0x88] sm:$0xff]  ;;  %v328_v15 = vpack.c.bf16 %v67_v11, %v65_v10  ;;  %v176_v18 = vld [vmem:[#allocation7 + $0x90] sm:$0xff] }
  0x3b   :  { %v158_v14 = vld [vmem:[#allocation7] sm:$0xff]  ;;  %325 = vmatpush1.bf16.msra.mxu0 %v324_v8  ;;  %v330_v16 = vpack.c.bf16 %v175_v13, %v174_v12  ;;  %v159_v17 = vld [vmem:[#allocation7 + $0x8] sm:$0xff]  ;;  %v177_v19 = vld [vmem:[#allocation7 + $0x98] sm:$0xff]  ;;  %v73_v0 = vsub.s32 0, %v72_v63  ;;  %v77_v2 = vsub.s32 1, %v72_v63 }
  0x3c   :  { %327 = vmatprep.subr.bf16.mxu0 %v326_v9  ;;  %v332_v20 = vpack.c.bf16 %v159_v17, %v158_v14  ;;  %v334_v21 = vpack.c.bf16 %v177_v19, %v176_v18  ;;  %v160_v22 = vld [vmem:[#allocation7 + $0x10] sm:$0xff]  ;;  %v161_v23 = vld [vmem:[#allocation7 + $0x18] sm:$0xff]  ;;  %v178_v24 = vld [vmem:[#allocation7 + $0xa0] sm:$0xff] }
  0x3d   :  { %331 = vmatprep.subr.bf16.mxu1 %v330_v16  ;;  %v179_v25 = vld [vmem:[#allocation7 + $0xa8] sm:$0xff]  ;;  %v336_v26 = vpack.c.bf16 %v161_v23, %v160_v22  ;;  %v60_v27 = vld [vmem:[#allocation2] sm:$0xff]  ;;  %v162_v29 = vld [vmem:[#allocation7 + $0x20] sm:$0xff] }
  0x3e   :  { %333 = vmatpush3.bf16.msra.mxu1 %v332_v20  ;;  %v338_v28 = vpack.c.bf16 %v179_v25, %v178_v24  ;;  %v163_v30 = vld [vmem:[#allocation7 + $0x28] sm:$0xff]  ;;  %v180_v31 = vld [vmem:[#allocation7 + $0xb0] sm:$0xff]  ;;  %v181_v32 = vld [vmem:[#allocation7 + $0xb8] sm:$0xff] }
  0x3f   :  { %329 = vmatpush1.bf16.msra.mxu0 %v328_v15  ;;  %335 = vmatprep.subr.bf16.mxu1 %v334_v21  ;;  %v340_v33 = vpack.c.bf16 %v163_v30, %v162_v29  ;;  %v342_v34 = vpack.c.bf16 %v181_v32, %v180_v31  ;;  %v164_v35 = vld [vmem:[#allocation7 + $0x30] sm:$0xff]  ;;  %v165_v36 = vld [vmem:[#allocation7 + $0x38] sm:$0xff]  ;;  %v182_v38 = vld [vmem:[#allocation7 + $0xc0] sm:$0xff] }
  0x40   :  { %v344_v37 = vpack.c.bf16 %v165_v36, %v164_v35  ;;  %v183_v39 = vld [vmem:[#allocation7 + $0xc8] sm:$0xff]  ;;  %v166_v41 = vld [vmem:[#allocation7 + $0x40] sm:$0xff]  ;;  %v184_v44 = vld [vmem:[#allocation7 + $0xd0] sm:$0xff] }
  0x41   :  { %v346_v40 = vpack.c.bf16 %v183_v39, %v182_v38  ;;  %v167_v42 = vld [vmem:[#allocation7 + $0x48] sm:$0xff]  ;;  %v185_v45 = vld [vmem:[#allocation7 + $0xd8] sm:$0xff]  ;;  %v168_v47 = vld [vmem:[#allocation7 + $0x50] sm:$0xff] }
  0x42   :  { %285 = vmatmul.mubr.msk.f32.vlgmr.msra.gmra.mrb[0].mxu0 %vm81_vm0, %v60_v27  ;;  %337 = vmatpush3.bf16.msra.mxu1 %v336_v26  ;;  %v348_v43 = vpack.c.bf16 %v167_v42, %v166_v41  ;;  %v350_v46 = vpack.c.bf16 %v185_v45, %v184_v44  ;;  %v169_v48 = vld [vmem:[#allocation7 + $0x58] sm:$0xff]  ;;  %v186_v50 = vld [vmem:[#allocation7 + $0xe0] sm:$0xff]  ;;  %v187_v51 = vld [vmem:[#allocation7 + $0xe8] sm:$0xff] }
  0x43   :  { %339 = vmatprep.subr.bf16.mxu1 %v338_v28  ;;  %v352_v49 = vpack.c.bf16 %v169_v48, %v168_v47  ;;  %v170_v52 = vld [vmem:[#allocation7 + $0x60] sm:$0xff]  ;;  %v354_v53 = vpack.c.bf16 %v187_v51, %v186_v50  ;;  %v171_v54 = vld [vmem:[#allocation7 + $0x68] sm:$0xff]  ;;  %v188_v55 = vld [vmem:[#allocation7 + $0xf0] sm:$0xff] }
  0x44   :  { %v189_v56 = vld [vmem:[#allocation7 + $0xf8] sm:$0xff]  ;;  %v356_v57 = vpack.c.bf16 %v171_v54, %v170_v52  ;;  %v172_v59 = vld [vmem:[#allocation7 + $0x70] sm:$0xff] }
  0x45   :  { %v358_v58 = vpack.c.bf16 %v189_v56, %v188_v55  ;;  %v173_v60 = vld [vmem:[#allocation7 + $0x78] sm:$0xff] }
  0x46   :  { %341 = vmatpush3.bf16.msra.mxu1 %v340_v33  ;;  %v360_v61 = vpack.c.bf16 %v173_v60, %v172_v59  ;;  %v69_v1 = vld [vmem:[%s564_s2] sm:$0x3]  ;;  %s477_s2 = smov [#allocation8]  }
  0x47   :  { %343 = vmatprep.subr.bf16.mxu1 %v342_v34  ;;  %v74_v3 = vrot.slane %v69_v1, %v73_v0  ;;  %v78_v4 = vrot.slane %v69_v1, %v77_v2  ;;  %v286_v12 = vld [vmem:[%s566_s4] ss:$0 sm:$0xff]  ;;  %s275_s9 = sshll.u32 %s477_s2, 4  ;;  %s276_s9 = int_to_ptr.vmem [resolvable:$true] %s275_s9 }
  0x48   :  { %s441_s10 = scalar_lea.vmem %s276_s9, 128  ;;  %p446_p11 = scmp.lt.s32.totalorder %s276_s9, %s276_s9 }
  0x49   :  { %p442_p10 = scmp.ne.s32.totalorder %s276_s9, %s441_s10  ;;  %p447_p12 = scmp.lt.s32.totalorder %s441_s10, %s441_s10 }
  0x4a   :  { %345 = vmatpush3.bf16.msra.mxu1 %v344_v37 }
  0x4b   :  { %347 = vmatprep.subr.bf16.mxu1 %v346_v40  ;;  %p448_p13 = por %p447_p12, %p446_p11 }
  0x4d   :  { %p449_p0 = pnand %p448_p13, %p442_p10 }
  0x4e   :  { %349 = vmatpush3.bf16.msra.mxu1 %v348_v43 }
  0x4f   :  { %351 = vmatprep.subr.bf16.mxu1 %v350_v46 }
  0x52   :  { %353 = vmatpush3.bf16.msra.mxu1 %v352_v49 }
  0x53   :  { %355 = vmatprep.subr.bf16.mxu1 %v354_v53 }
  0x56   :  { %357 = vmatpush3.bf16.msra.mxu1 %v356_v57 }
  0x57   :  { %359 = vmatprep.subr.bf16.mxu1 %v358_v58 }
  0x5a   :  { %361 = vmatpush3.bf16.msra.mxu1 %v360_v61 }
 0x115   :  { %v151_v5 = vpop.f32.mrb[0].mxu0 }
 0x116   :  { %v152_v6 = vadd.f32 %v151_v5, %v74_v3  ;;  %v153_v7 = vpop.f32.mrb[1].mxu0 }
 0x117   :  { %v154_v8 = vadd.f32 %v153_v7, %v78_v4 }
 0x119   :  { %371 = vtanh.f32 %v154_v8 }
 0x11a   :  { %373 = vtanh.f32 %v152_v6 }
 0x123   :  { %v372_v9 = vpop.eup %371 }
 0x124   :  { %v374_v10 = vpop.eup %373  ;;  %261 = vmatprep.mubr.f32.mxu1 %v372_v9 }
 0x125   :  { %262 = vmatmul.mubr.f32.vlgmr.msra.gmra.mrb[0].mxu1 %v374_v10 }
 0x1f8   :  { %v319_v11 = vpop.f32.mrb[0].mxu1 }
 0x1f9   :  { %v320_v13 = vpop.f32.mrb[1].mxu1 }
 0x1fa   :  { %v321_v14 = vadd.f32 %v320_v13, %v319_v11 }
 0x1fc   :  { %v264_v15 = vadd.f32 %v321_v14, %v286_v12 }
 0x1fe   :  { %v267_v16 = vmax.f32 %v264_v15, 0.0 }
 0x200   :  { %268 = vst [vmem:[#allocation8] sm:$0xff] %v267_v16 }
 0x201   :  { %452 = shalt.err (!%p449_p0)
}
 0x202   :  { %s453_s13 = scalar_lea.hbm %s567_s5, 128 }
 0x203   :  { %p454_p1 = scmp.ne.s32.totalorder %s567_s5, %s453_s13  ;;  %p457_p2 = scmp.lt.u32.totalorder %s453_s13, %s567_s5 }
 0x205   :  { %p459_p3 = pnand %p457_p2, %p454_p1 }
 0x207   :  { %462 = shalt.err (!%p459_p3)
}
 0x208   :  { %278 = dma.vmem_to_hbm [thread:$0]  %s276_s9, 128, %s567_s5, [#allocation4]  }
 0x209   :  { %467 = dma.done.wait [#allocation4], 128  }
 0x20a   :  { %468 = vsyncadd [#allocation4], 4294967168 }
 0x20b   :  { %282 = vsyncpa [#allocation3], 1 }
 0x20c   :  { %283 = vsyncpa [#allocation6], 1 }
 0x20d   :  { %284 = vsyncpa [#allocation4], 1 }

</bundles_post_ra>
